<compile_context>
chip_gen: v6e
topology: v6e:2x2x1
jax: 0.10.0
libtpu: 0.0.40
codegen_flags: <defaults>
</compile_context>

<pallas_src>
import jax
import jax.numpy as jnp
from jax.experimental import pallas as pl
from jax.experimental.pallas import tpu as pltpu


def _elemul_kernel(scale_ref, x_ref, o_ref):
    # scale_ref: (TM, 1)   x_ref: (TM, TN)   o_ref: (TM, TN)
    # Broadcast along the lane axis inside the kernel (cheap VALU work);
    # product is computed at the promoted dtype, then cast once.
    o_ref[...] = (x_ref[...] * scale_ref[...]).astype(o_ref.dtype)


def _lane_tile(hw):
    """Largest lane-dense (multiple-of-128) tile <= 4096 that divides H*W."""
    if hw % 128 != 0:
        # TODO(synk): for H*W not a multiple of 128 (e.g. 7*7), regroup K
        # channels per row in the wrapper to regain lane-dense stores.
        return hw  # full-extent last dim is always a legal block shape
    for cand in (4096, 2048, 1024, 512, 384, 256, 128):
        if cand <= hw and hw % cand == 0:
            return cand
    return hw


def _sublane_tile(nc, tn, itemsizes, target_bytes=2 << 20):
    """Pick TM so the x tile is ~target_bytes and TM is sublane-pack aligned."""
    # Required sublane multiple: 8 for 4-byte, 16 for 2-byte, 32 for 1-byte.
    sub = max(max(32 // b for b in itemsizes), 8)
    x_itemsize = itemsizes[0]
    tm = max(sub, target_bytes // (tn * x_itemsize))
    if tm >= nc:
        return nc  # full extent
    return max(sub, (tm // sub) * sub)


def ele_mul(x0, x1, donate_x1=False):
    """EleMulLayer forward: x0.view(N, C, 1, 1) * x1 with x1 of shape (N, C, H, W)."""
    n, c, h, w = x1.shape
    if x0.size != n * c:
        raise ValueError(
            f"x0 has {x0.size} elements, expected N*C={n * c} "
            f"(x0.shape={x0.shape}, x1.shape={x1.shape})"
        )
    out_dtype = jnp.result_type(x0.dtype, x1.dtype)

    nc, hw = n * c, h * w
    scale = x0.reshape(nc, 1)       # keep original dtype; promote in-kernel
    x_flat = x1.reshape(nc, hw)

    tn = _lane_tile(hw)
    itemsizes = (
        jnp.dtype(x1.dtype).itemsize,
        jnp.dtype(x0.dtype).itemsize,
        jnp.dtype(out_dtype).itemsize,
    )
    tm = _sublane_tile(nc, tn, itemsizes)

    grid = (pl.cdiv(nc, tm), pl.cdiv(hw, tn))

    extra_kwargs = {}
    if donate_x1 and x1.dtype == out_dtype:
        # In-place update of the feature map when the caller allows it:
        # removes one full HBM stream for this purely bandwidth-bound op.
        extra_kwargs["input_output_aliases"] = {1: 0}

    out_flat = pl.pallas_call(
        _elemul_kernel,
        out_shape=jax.ShapeDtypeStruct((nc, hw), out_dtype),
        grid=grid,
        in_specs=[
            pl.BlockSpec((tm, 1), lambda i, j: (i, 0)),   # per-row scale
            pl.BlockSpec((tm, tn), lambda i, j: (i, j)),  # feature-map tile
        ],
        out_specs=pl.BlockSpec((tm, tn), lambda i, j: (i, j)),
        compiler_params=pltpu.CompilerParams(
            dimension_semantics=("parallel", "parallel"),
        ),
        **extra_kwargs,
    )(scale, x_flat)

    return out_flat.reshape(n, c, h, w)


if __name__ == "__main__":
    key = jax.random.PRNGKey(0)
    k0, k1 = jax.random.split(key)

    N, C, H, W = 2, 4, 16, 16
    x0 = jax.random.normal(k0, (N, C), dtype=jnp.float32)        # per-(n,c) scale
    x1 = jax.random.normal(k1, (N, C, H, W), dtype=jnp.float32)  # NCHW feature map

    out = ele_mul(x0, x1)
    out = jax.block_until_ready(out)

    # Reference (pure JAX) check of the PyTorch semantics.
    ref = x0.reshape(N, C, 1, 1) * x1
    assert out.shape == (N, C, H, W)
    assert out.dtype == ref.dtype
    assert jnp.allclose(out, ref, atol=1e-6, rtol=1e-6)

    print("KERNEL_OK")
</pallas_src>

<mosaic_0001>
module attributes {stable_mosaic.version = 11 : i64} {
  func.func @_elemul_kernel(%arg0: i32, %arg1: i32, %arg2: memref<8x1xf32, #tpu.memory_space<vmem>>, %arg3: memref<8x256xf32, #tpu.memory_space<vmem>>, %arg4: memref<8x256xf32, #tpu.memory_space<vmem>>) attributes {dimension_semantics = [#tpu.dimension_semantics<parallel>, #tpu.dimension_semantics<parallel>], iteration_bounds = array<i64: 1, 1>, scalar_prefetch = 0 : i64, scratch_operands = 0 : i64, tpu.core_type = #tpu.core_type<tc>, window_params = [{transform_indices = @transform_0, window_bounds = array<i64: 8, 1>}, {transform_indices = @transform_1, window_bounds = array<i64: 8, 256>}, {transform_indices = @transform_2, window_bounds = array<i64: 8, 256>}]} {
    %c0 = arith.constant 0 : index
    %c0_0 = arith.constant 0 : index
    %0 = vector.load %arg3[%c0, %c0_0] : memref<8x256xf32, #tpu.memory_space<vmem>>, vector<8x256xf32>
    %c0_1 = arith.constant 0 : index
    %c0_2 = arith.constant 0 : index
    %1 = vector.load %arg2[%c0_1, %c0_2] : memref<8x1xf32, #tpu.memory_space<vmem>>, vector<8x1xf32>
    %2 = vector.broadcast %1 : vector<8x1xf32> to vector<8x256xf32>
    %3 = arith.mulf %0, %2 : vector<8x256xf32>
    %c0_3 = arith.constant 0 : index
    %c0_4 = arith.constant 0 : index
    %4 = vector.load %arg4[%c0_3, %c0_4] : memref<8x256xf32, #tpu.memory_space<vmem>>, vector<8x256xf32>
    tpu.vector_store %arg4[%c0_3, %c0_4], %3 {strides = array<i32>} : memref<8x256xf32, #tpu.memory_space<vmem>>, vector<8x256xf32>,
    return
  }
  func.func @transform_0(%arg0: i32, %arg1: i32) -> (i32, i32) {
    %c0_i32 = arith.constant 0 : i32
    %c0_i32_0 = arith.constant 0 : i32
    return %arg0, %c0_i32 : i32, i32
  }
  func.func @transform_1(%arg0: i32, %arg1: i32) -> (i32, i32) {
    %c0_i32 = arith.constant 0 : i32
    return %arg0, %arg1 : i32, i32
  }
  func.func @transform_2(%arg0: i32, %arg1: i32) -> (i32, i32) {
    %c0_i32 = arith.constant 0 : i32
    return %arg0, %arg1 : i32, i32
  }
}

</mosaic_0001>

<bundles_post_ra>
// kernel: tpu_custom_call.1
= control target key start
LH: loop header
LB: loop body
LE: loop exit
PB: predicated region body
PF: predicated region fallthrough
CT: control target
= control target key end

     0   :  { %7 = vsyncpa [#allocation3], 0  ;;  %s126_s0 = inlined_call_operand.vmem [shape: f32[8,1], index: 0, kind: input, shape index: {}]   ;;  %s127_s1 = inlined_call_operand.hbm [shape: f32[8,256], index: 1, kind: input, shape index: {}]   ;;  %s128_s2 = inlined_call_operand.hbm [shape: f32[8,256], index: 2, kind: output, shape index: {}]  }
   0x1   :  { %8 = vsyncpa [#allocation4], 0  ;;  %s99_s9 = smov [#allocation2]  }
   0x2   :  { %s17_s10 = sshll.u32 %s99_s9, 4  ;;  %s18_s10 = int_to_ptr.vmem [resolvable:$true] %s17_s10 }
   0x3   :  { %s63_s11 = scalar_lea.vmem %s18_s10, 256  ;;  %p68_p1 = scmp.lt.s32.totalorder %s18_s10, %s18_s10 }
   0x4   :  { %p64_p0 = scmp.ne.s32.totalorder %s18_s10, %s63_s11  ;;  %p69_p2 = scmp.lt.s32.totalorder %s63_s11, %s63_s11 }
   0x6   :  { %p70_p3 = por %p69_p2, %p68_p1 }
   0x8   :  { %p71_p4 = pnand %p70_p3, %p64_p0 }
   0xa   :  { %74 = shalt.err (!%p71_p4)
}
   0xb   :  { %20 = dma.hbm_to_vmem [thread:$0]  %s127_s1, 256, %s18_s10, [#allocation3]  }
   0xc   :  { %95 = dma.done.wait [#allocation3], 256  }
   0xd   :  { %96 = vsyncadd [#allocation3], 4294967040  ;;  %v100_v0 = vmov 0   ;;  %v26_v1 = vld [vmem:[%s126_s0] sm:$0xff]  ;;  %v25_v3 = vld [vmem:[#allocation2 + $0x8] sm:$0xff]  ;;  %s101_s16 = smov [#allocation5]  }
   0xe   :  { %54 = vset.pattern.permute.xlu0 %v100_v0  ;;  %v24_v2 = vld [vmem:[#allocation2] sm:$0xff]  ;;  %s42_s17 = sshll.u32 %s101_s16, 4  ;;  %s43_s17 = int_to_ptr.vmem [resolvable:$true] %s42_s17 }
   0xf   :  { %29 = vperm.xlu0 %54, %v26_v1   ;;  %s75_s1 = scalar_lea.vmem %s43_s17, 256  ;;  %p80_p6 = scmp.lt.s32.totalorder %s43_s17, %s43_s17 }
  0x10   :  { %p76_p5 = scmp.ne.s32.totalorder %s43_s17, %s75_s1  ;;  %p81_p7 = scmp.lt.s32.totalorder %s75_s1, %s75_s1 }
  0x12   :  { %p82_p8 = por %p81_p7, %p80_p6 }
  0x14   :  { %p83_p9 = pnand %p82_p8, %p76_p5 }
  0x8a   :  { %v30_v4 = vpop.permute.xlu0 %29 }
  0x8b   :  { %v32_v5 = vmul.f32 %v30_v4, %v24_v2  ;;  %v33_v6 = vmul.f32 %v30_v4, %v25_v3 }
  0x8d   :  { %34 = vst [vmem:[#allocation5] sm:$0xff] %v32_v5  ;;  %35 = vst [vmem:[#allocation5 + $0x8] sm:$0xff] %v33_v6 }
  0x8e   :  { %86 = shalt.err (!%p83_p9)
}
  0x8f   :  { %45 = dma.vmem_to_hbm [thread:$0]  %s43_s17, 256, %s128_s2, [#allocation4]  }
  0x90   :  { %97 = dma.done.wait [#allocation4], 256  }
  0x91   :  { %98 = vsyncadd [#allocation4], 4294967040 }
  0x92   :  { %49 = vsyncpa [#allocation3], 1 }
  0x93   :  { %50 = vsyncpa [#allocation4], 1 }

</bundles_post_ra>
